<compile_context>
chip_gen: v5e
topology: v5e:2x2
jax: 0.10.0
libtpu: 0.0.40
codegen_flags: <defaults>
</compile_context>

<pallas_src>
import jax
import jax.numpy as jnp
from jax.experimental import pallas as pl
from jax.experimental.pallas import tpu as pltpu


def _round_up(x: int, m: int) -> int:
    return ((x + m - 1) // m) * m


def _additive_attn_kernel(enc_ref, dec_ref, mask_ref, we_ref, v_ref, out_ref):
    # enc_ref : (TB, Sp, E)  bf16 encoder tile (streamed per grid step)
    # dec_ref : (TB, 1, D)   f32, dec @ Wd^T + bd + be (precomputed in wrapper)
    # mask_ref: (TB, Sp)     f32, 1.0 = keep, 0.0 = masked (-inf)
    # we_ref  : (E, D)       bf16 W_enc^T, VMEM-resident across grid steps
    # v_ref   : (1, 1, D)    f32 v, VMEM-resident across grid steps
    # out_ref : (TB, Sp)     f32 softmax output
    tb, sp, e = enc_ref.shape
    d = we_ref.shape[1]

    # One MXU matmul with M = TB*Sp rows.  The reshape is a free view because
    # Sp is a multiple of the bf16 sublane granule (16) and the lane dim (E)
    # is untouched.  bf16 operands, f32 accumulation.
    enc2d = enc_ref[...].reshape(tb * sp, e)
    mapped = jnp.dot(enc2d, we_ref[...],
                     preferred_element_type=jnp.float32)          # (TB*Sp, D) f32
    mapped = mapped.reshape(tb, sp, d)

    w = jnp.tanh(mapped + dec_ref[...])                           # (TB, Sp, D) f32

    # v-contraction as VPU multiply + XLU lane reduce (keeps the MXU free).
    scores = jnp.sum(w * v_ref[...], axis=-1)                     # (TB, Sp)

    neg_inf = jnp.float32(-jnp.inf)
    scores = jnp.where(mask_ref[...] > 0.0, scores, neg_inf)

    # Softmax over the (padded) sequence axis; padded columns give exp(-inf)=0.
    m = jnp.max(scores, axis=-1, keepdims=True)
    ex = jnp.exp(scores - m)
    denom = jnp.sum(ex, axis=-1, keepdims=True)
    out_ref[...] = ex / denom                                     # exact normalization


def additive_attention(enc_outputs, dec_hiddens, src_mask,
                       W_enc, b_enc, W_dec, b_dec, v):
    """enc_outputs: (S, B, E) f32, dec_hiddens: (B, D) f32, src_mask: (B, S) bool.
    W_enc: (D, E), b_enc: (D,), W_dec: (D, D), b_dec: (D,), v: (D,) (PyTorch layout)."""
    S, B, E = enc_outputs.shape
    D = dec_hiddens.shape[1]

    # ---- wrapper-side glue --------------------------------------------------
    # Decoder projection + both biases folded into one small batched XLA matmul.
    dec_proj = (dec_hiddens @ W_dec.T + b_dec + b_enc).astype(jnp.float32)   # (B, D)

    # MXU operands in bf16 (f32 accumulation inside the kernel); elementwise
    # math stays f32.  mask/out stay f32 as well.
    enc = jnp.transpose(enc_outputs, (1, 0, 2)).astype(jnp.bfloat16)   # (B, S, E)
    we_t = W_enc.T.astype(jnp.bfloat16)                                # (E, D)
    v_row = v.astype(jnp.float32).reshape(1, 1, D)

    # Pad S only to the bf16 sublane granule; E and D stay unpadded.
    SUB = 16
    Sp = _round_up(S, SUB)
    mask = src_mask.astype(jnp.float32)
    if Sp > S:
        enc = jnp.pad(enc, ((0, 0), (0, Sp - S), (0, 0)))
        # padded columns carry mask=0 -> -inf score -> exp()=0
        mask = jnp.pad(mask, ((0, 0), (0, Sp - S)))

    # ---- batch tile sizing against MXU rows and VMEM ------------------------
    def step_vmem_bytes(tb):
        enc_tile = 2 * tb * Sp * E * 2          # double-buffered bf16 enc stream
        dec_tile = 2 * tb * D * 4               # double-buffered dec_proj tile
        mask_out = 2 * 2 * tb * Sp * 4          # mask + out, double-buffered
        resident = E * D * 2 + D * 4            # we_t + v (constant index_map)
        interm = 2 * tb * Sp * D * 4            # mapped + tanh(), f32 intermediates
        return enc_tile + dec_tile + mask_out + resident + interm

    VMEM_BUDGET = 12 * 1024 * 1024              # fits default scoped VMEM on v5e/v6e/v7x
    tb = max(1, 2048 // Sp)                     # target ~2048 MXU rows per step
    while tb > 8 and step_vmem_bytes(tb) > VMEM_BUDGET:
        tb //= 2

    if tb >= B:
        if B >= 16:
            # Keep >= 2 grid steps so both v7x TensorCores get work.
            TB = _round_up((B + 1) // 2, 8)
        else:
            TB = B                              # single step covers the whole batch
    else:
        TB = max(8, (tb // 8) * 8)              # keep 2nd-to-last block dims 8-aligned
    Bp = _round_up(B, TB)

    if Bp > B:
        enc = jnp.pad(enc, ((0, Bp - B), (0, 0), (0, 0)))
        dec_proj = jnp.pad(dec_proj, ((0, Bp - B), (0, 0)))
        # All-ones mask on padded batch rows keeps their softmax finite;
        # they are sliced off before returning.
        mask = jnp.concatenate(
            [mask, jnp.ones((Bp - B, Sp), jnp.float32)], axis=0)

    dec_proj = dec_proj.reshape(Bp, 1, D)

    out = pl.pallas_call(
        _additive_attn_kernel,
        out_shape=jax.ShapeDtypeStruct((Bp, Sp), jnp.float32),
        grid_spec=pltpu.PrefetchScalarGridSpec(
            num_scalar_prefetch=0,
            grid=(Bp // TB,),
            in_specs=[
                pl.BlockSpec((TB, Sp, E), lambda i: (i, 0, 0)),   # enc tile (streamed)
                pl.BlockSpec((TB, 1, D), lambda i: (i, 0, 0)),    # dec_proj tile
                pl.BlockSpec((TB, Sp), lambda i: (i, 0)),         # mask tile
                pl.BlockSpec((E, D), lambda i: (0, 0)),           # W_enc^T (resident)
                pl.BlockSpec((1, 1, D), lambda i: (0, 0, 0)),     # v (resident)
            ],
            out_specs=pl.BlockSpec((TB, Sp), lambda i: (i, 0)),
        ),
        compiler_params=pltpu.CompilerParams(
            # Independent batch axis -> shards across the 2 TCs on v7x;
            # no-op on single-TC v5e/v6e.
            dimension_semantics=("parallel",),
            vmem_limit_bytes=32 * 1024 * 1024),
    )(enc, dec_proj, mask, we_t, v_row)

    return out[:B, :S]


def _reference(enc_outputs, dec_hiddens, src_mask, W_enc, b_enc, W_dec, b_dec, v):
    enc = jnp.transpose(enc_outputs, (1, 0, 2))                    # (B, S, E)
    dec = dec_hiddens[:, None, :]                                  # (B, 1, D)
    mapped_enc = enc @ W_enc.T + b_enc
    mapped_dec = dec @ W_dec.T + b_dec
    scores = jnp.tanh(mapped_enc + mapped_dec) @ v                 # (B, S)
    scores = jnp.where(src_mask, scores, -jnp.inf)
    return jax.nn.softmax(scores, axis=1)


if __name__ == "__main__":
    # Small shapes consistent with the module's forward.
    S, B, E, D = 8, 2, 32, 32

    key = jax.random.PRNGKey(0)
    k_enc, k_dec, k_we, k_be, k_wd, k_bd, k_v = jax.random.split(key, 7)

    enc_outputs = jax.random.normal(k_enc, (S, B, E), dtype=jnp.float32)
    dec_hiddens = jax.random.normal(k_dec, (B, D), dtype=jnp.float32)

    # Deterministic parameter init (shapes match nn.Linear / nn.Parameter).
    W_enc = jax.random.normal(k_we, (D, E), dtype=jnp.float32) * 0.1
    b_enc = jax.random.normal(k_be, (D,), dtype=jnp.float32) * 0.1
    W_dec = jax.random.normal(k_wd, (D, D), dtype=jnp.float32) * 0.1
    b_dec = jax.random.normal(k_bd, (D,), dtype=jnp.float32) * 0.1
    v = jax.random.uniform(k_v, (D,), dtype=jnp.float32)   # torch.rand equivalent

    # Boolean source mask; each row keeps at least one position (finite softmax,
    # matching PyTorch's behavior for non-degenerate masks).
    src_mask = jnp.array(
        [[True] * 6 + [False] * 2,
         [True] * 5 + [False] * 3], dtype=bool)

    out = additive_attention(enc_outputs, dec_hiddens, src_mask,
                             W_enc, b_enc, W_dec, b_dec, v)
    out = jax.block_until_ready(out)

    ref = _reference(enc_outputs, dec_hiddens, src_mask,
                     W_enc, b_enc, W_dec, b_dec, v)
    assert out.shape == (B, S)
    # Exact-divide softmax: rows sum to 1 up to f32 rounding.
    assert jnp.allclose(out.sum(axis=1), 1.0, atol=1e-5)
    # Tolerance accounts for bf16 MXU operands (accumulation stays f32).
    assert jnp.allclose(out, ref, atol=1e-2, rtol=1e-2), (out, ref)

    print("KERNEL_OK")
</pallas_src>

<mosaic_0001>
module attributes {stable_mosaic.version = 11 : i64} {
  func.func @_additive_attn_kernel(%arg0: i32, %arg1: memref<2x16x32xbf16, #tpu.memory_space<vmem>>, %arg2: memref<2x1x32xf32, #tpu.memory_space<vmem>>, %arg3: memref<2x16xf32, #tpu.memory_space<vmem>>, %arg4: memref<32x32xbf16, #tpu.memory_space<vmem>>, %arg5: memref<1x1x32xf32, #tpu.memory_space<vmem>>, %arg6: memref<2x16xf32, #tpu.memory_space<vmem>>) attributes {dimension_semantics = [#tpu.dimension_semantics<parallel>], iteration_bounds = array<i64: 1>, scalar_prefetch = 0 : i64, scratch_operands = 0 : i64, tpu.core_type = #tpu.core_type<tc>, window_params = [{transform_indices = @transform_0, window_bounds = array<i64: 2, 16, 32>}, {transform_indices = @transform_1, window_bounds = array<i64: 2, 1, 32>}, {transform_indices = @transform_2, window_bounds = array<i64: 2, 16>}, {pipeline_mode = #tpu.pipeline_mode<synchronous>, transform_indices = @transform_3, window_bounds = array<i64: 32, 32>}, {pipeline_mode = #tpu.pipeline_mode<synchronous>, transform_indices = @transform_4, window_bounds = array<i64: 1, 1, 32>}, {transform_indices = @transform_5, window_bounds = array<i64: 2, 16>}]} {
    %c0 = arith.constant 0 : index
    %c0_0 = arith.constant 0 : index
    %c0_1 = arith.constant 0 : index
    %0 = vector.load %arg1[%c0, %c0_0, %c0_1] : memref<2x16x32xbf16, #tpu.memory_space<vmem>>, vector<2x16x32xbf16>
    %1 = vector.shape_cast %0 : vector<2x16x32xbf16> to vector<32x32xbf16>
    %c0_2 = arith.constant 0 : index
    %c0_3 = arith.constant 0 : index
    %2 = vector.load %arg4[%c0_2, %c0_3] : memref<32x32xbf16, #tpu.memory_space<vmem>>, vector<32x32xbf16>
    %cst = arith.constant dense<0.000000e+00> : vector<32x32xf32>
    %3 = tpu.matmul %1, %2, %cst {dimension_numbers = #tpu.dot_dimension_numbers<[1], [0], [0], [1], [0, 0, 1, 1], [], []>} : vector<32x32xbf16>, vector<32x32xbf16>, vector<32x32xf32> -> vector<32x32xf32>
    %4 = vector.shape_cast %3 : vector<32x32xf32> to vector<2x16x32xf32>
    %c0_4 = arith.constant 0 : index
    %c0_5 = arith.constant 0 : index
    %c0_6 = arith.constant 0 : index
    %5 = vector.load %arg2[%c0_4, %c0_5, %c0_6] : memref<2x1x32xf32, #tpu.memory_space<vmem>>, vector<2x1x32xf32>
    %6 = vector.broadcast %5 : vector<2x1x32xf32> to vector<2x16x32xf32>
    %7 = arith.addf %4, %6 : vector<2x16x32xf32>
    %8 = math.tanh %7 : vector<2x16x32xf32>
    %c0_7 = arith.constant 0 : index
    %c0_8 = arith.constant 0 : index
    %c0_9 = arith.constant 0 : index
    %9 = vector.load %arg5[%c0_7, %c0_8, %c0_9] : memref<1x1x32xf32, #tpu.memory_space<vmem>>, vector<1x1x32xf32>
    %10 = vector.broadcast %9 : vector<1x1x32xf32> to vector<2x16x32xf32>
    %11 = arith.mulf %8, %10 : vector<2x16x32xf32>
    %cst_10 = arith.constant dense<0.000000e+00> : vector<2x16xf32>
    %12 = vector.multi_reduction <add>, %11, %cst_10 [2] : vector<2x16x32xf32> to vector<2x16xf32>
    %c0_11 = arith.constant 0 : index
    %c0_12 = arith.constant 0 : index
    %13 = vector.load %arg3[%c0_11, %c0_12] : memref<2x16xf32, #tpu.memory_space<vmem>>, vector<2x16xf32>
    %cst_13 = arith.constant 0.000000e+00 : f32
    %14 = vector.broadcast %cst_13 : f32 to vector<2x16xf32>
    %15 = arith.cmpf ogt, %13, %14 : vector<2x16xf32>
    %cst_14 = arith.constant 0xFF800000 : f32
    %16 = vector.broadcast %cst_14 : f32 to vector<2x16xf32>
    %17 = arith.select %15, %12, %16 : vector<2x16xi1>, vector<2x16xf32>
    %cst_15 = arith.constant dense<0xFF800000> : vector<2xf32>
    %18 = vector.multi_reduction <maximumf>, %17, %cst_15 [1] : vector<2x16xf32> to vector<2xf32>
    %19 = vector.shape_cast %18 : vector<2xf32> to vector<2x1xf32>
    %20 = vector.broadcast %19 : vector<2x1xf32> to vector<2x16xf32>
    %21 = arith.subf %17, %20 : vector<2x16xf32>
    %22 = math.exp %21 : vector<2x16xf32>
    %cst_16 = arith.constant dense<0.000000e+00> : vector<2xf32>
    %23 = vector.multi_reduction <add>, %22, %cst_16 [1] : vector<2x16xf32> to vector<2xf32>
    %24 = vector.shape_cast %23 : vector<2xf32> to vector<2x1xf32>
    %25 = vector.broadcast %24 : vector<2x1xf32> to vector<2x16xf32>
    %26 = arith.divf %22, %25 : vector<2x16xf32>
    %c0_17 = arith.constant 0 : index
    %c0_18 = arith.constant 0 : index
    %27 = vector.load %arg6[%c0_17, %c0_18] : memref<2x16xf32, #tpu.memory_space<vmem>>, vector<2x16xf32>
    tpu.vector_store %arg6[%c0_17, %c0_18], %26 {strides = array<i32>} : memref<2x16xf32, #tpu.memory_space<vmem>>, vector<2x16xf32>,
    return
  }
  func.func @transform_0(%arg0: i32) -> (i32, i32, i32) {
    %c0_i32 = arith.constant 0 : i32
    %c0_i32_0 = arith.constant 0 : i32
    %c0_i32_1 = arith.constant 0 : i32
    return %arg0, %c0_i32, %c0_i32_0 : i32, i32, i32
  }
  func.func @transform_1(%arg0: i32) -> (i32, i32, i32) {
    %c0_i32 = arith.constant 0 : i32
    %c0_i32_0 = arith.constant 0 : i32
    %c0_i32_1 = arith.constant 0 : i32
    return %arg0, %c0_i32, %c0_i32_0 : i32, i32, i32
  }
  func.func @transform_2(%arg0: i32) -> (i32, i32) {
    %c0_i32 = arith.constant 0 : i32
    %c0_i32_0 = arith.constant 0 : i32
    return %arg0, %c0_i32 : i32, i32
  }
  func.func @transform_3(%arg0: i32) -> (i32, i32) {
    %c0_i32 = arith.constant 0 : i32
    %c0_i32_0 = arith.constant 0 : i32
    %c0_i32_1 = arith.constant 0 : i32
    return %c0_i32, %c0_i32_0 : i32, i32
  }
  func.func @transform_4(%arg0: i32) -> (i32, i32, i32) {
    %c0_i32 = arith.constant 0 : i32
    %c0_i32_0 = arith.constant 0 : i32
    %c0_i32_1 = arith.constant 0 : i32
    %c0_i32_2 = arith.constant 0 : i32
    return %c0_i32, %c0_i32_0, %c0_i32_1 : i32, i32, i32
  }
  func.func @transform_5(%arg0: i32) -> (i32, i32) {
    %c0_i32 = arith.constant 0 : i32
    %c0_i32_0 = arith.constant 0 : i32
    return %arg0, %c0_i32 : i32, i32
  }
}

</mosaic_0001>

<bundles_post_ra>
// kernel: tpu_custom_call.1
= control target key start
LH: loop header
LB: loop body
LE: loop exit
PB: predicated region body
PF: predicated region fallthrough
CT: control target
= control target key end

     0   :  { %10 = vsyncpa [#allocation3], 0  ;;  %s482_s0 = inlined_call_operand.hbm [shape: bf16[2,16,32], index: 0, kind: input, shape index: {}]   ;;  %s483_s1 = inlined_call_operand.hbm [shape: f32[2,1,32], index: 1, kind: input, shape index: {}]   ;;  %s484_s2 = inlined_call_operand.hbm [shape: f32[2,16], index: 2, kind: input, shape index: {}]   ;;  %s485_s3 = inlined_call_operand.hbm [shape: bf16[32,32], index: 3, kind: input, shape index: {}]   ;;  %s486_s4 = inlined_call_operand.vmem [shape: f32[1,1,32], index: 4, kind: input, shape index: {}]   ;;  %s487_s5 = inlined_call_operand.hbm [shape: f32[2,16], index: 5, kind: output, shape index: {}]  }
   0x1   :  { %11 = vsyncpa [#allocation6], 0 }
   0x2   :  { %12 = vsyncpa [#allocation9], 0  ;;  %s31_s20 = sshll.u32 %s483_s1, 4  ;;  %s32_s20 = int_to_ptr.hbm [resolvable:$true] %s31_s20 }
   0x3   :  { %13 = vsyncpa [#allocation4], 0  ;;  %s416_s21 = smov [#allocation5]   ;;  %s18_s25 = sshll.u32 %s482_s0, 4  ;;  %s19_s25 = int_to_ptr.hbm [resolvable:$true] %s18_s25 }
   0x4   :  { %s33_s22 = sshll.u32 %s416_s21, 4  ;;  %s417_s26 = smov 16   ;;  %s34_s22 = int_to_ptr.vmem [resolvable:$true] %s33_s22 }
   0x5   :  { %s418_s27 = smov 1   ;;  %s419_s28 = smov [#allocation2]  }
   0x6   :  { %39 = dma.hbm_to_vmem [thread:$0]  %s32_s20, 32, %s34_s22, [#allocation6], %s417_s26, %s417_s26, %s418_s27  }
   0x7   :  { %s20_s29 = sshll.u32 %s419_s28, 4  ;;  %s420_s30 = smov 64   ;;  %s21_s29 = int_to_ptr.vmem [resolvable:$true] %s20_s29 }
   0x8   :  { %s421_s6 = smov 4   ;;  %s45_s8 = sshll.u32 %s484_s2, 4  ;;  %s46_s8 = int_to_ptr.hbm [resolvable:$true] %s45_s8 }
   0x9   :  { %26 = dma.hbm_to_vmem [thread:$0]  %s19_s25, 256, %s21_s29, [#allocation3], %s420_s30, %s420_s30, %s421_s6  }
   0xa   :  { %s422_s9 = smov [#allocation7]   ;;  %s55_s12 = sshll.u32 %s485_s3, 4  ;;  %s56_s12 = int_to_ptr.hbm [resolvable:$true] %s55_s12 }
   0xb   :  { %s47_s10 = sshll.u32 %s422_s9, 4  ;;  %s423_s13 = smov [#allocation8]   ;;  %s48_s10 = int_to_ptr.vmem [resolvable:$true] %s47_s10 }
   0xc   :  { %50 = dma.hbm_to_vmem [thread:$0]  %s46_s8, 32, %s48_s10, [#allocation6]  }
   0xd   :  { %s57_s14 = sshll.u32 %s423_s13, 4  ;;  %s58_s14 = int_to_ptr.vmem [resolvable:$true] %s57_s14 }
   0xe   :  { %63 = dma.hbm_to_vmem [thread:$0]  %s56_s12, 256, %s58_s14, [#allocation9], %s420_s30, %s420_s30, %s421_s6  }
   0xf   :  { %408 = dma.done.wait [#allocation3], 256  }
  0x10   :  { %409 = vsyncadd [#allocation3], 4294967040 }
  0x11   :  { %410 = dma.done.wait [#allocation6], 64  }
  0x12   :  { %411 = vsyncadd [#allocation6], 4294967232 }
  0x13   :  { %412 = dma.done.wait [#allocation9], 256  }
  0x14   :  { %413 = vsyncadd [#allocation9], 4294967040  ;;  %v261_v0 = vld [vmem:[#allocation8 + $0x8] sm:$0xff]  ;;  %v260_v1 = vld [vmem:[#allocation8] sm:$0xff]  ;;  %vm113_vm0 = vcmask 261120   ;;  %v181_v27 = vlaneseq  ;;  %vm186_vm1 = vcmask 130112  }
  0x15   :  { %126 = vmatpush.bf16.msra.mxu0 %v261_v0  ;;  %262 = vmatpush.bf16.msra.mxu1 %v261_v0  ;;  %v258_v2 = vld [vmem:[#allocation2] sm:$0xff]  ;;  %v259_v3 = vld [vmem:[#allocation2 + $0x8] sm:$0xff]  ;;  %v273_v4 = vld [vmem:[#allocation5] ss:$0 sm:$0xff]  ;;  %vm191_vm2 = vcmask 1041409   ;;  %vm195_vm4 = vcmask 123904  }
  0x16   :  { %v274_v5 = vld [vmem:[#allocation5 + $0x1] ss:$0 sm:$0xff]  ;;  %v275_v10 = vld [vmem:[%s486_s4] ss:$0 sm:$0xff]  ;;  %v182_v30 = vand.u32 127, %v181_v27  ;;  %s424_s4 = smov [#allocation10]  }
  0x17   :  { %v175_v33 = vld [vmem:[#allocation7] sm:$0x3]  ;;  %s226_s15 = sshll.u32 %s424_s4, 4  ;;  %s228_s18 = sshll.u32 %s487_s5, 4  ;;  %s227_s15 = int_to_ptr.vmem [resolvable:$true] %s226_s15  ;;  %s229_s18 = int_to_ptr.hbm [resolvable:$true] %s228_s18 }
  0x18   :  { %v184_v31 = vadd.s32 4294967288, %v182_v30  ;;  %vm176_vm3 = vcmp.gt.f32.partialorder %v175_v33, 0.0 }
  0x19   :  { %127 = vmatpush.bf16.msra.mxu0 %v260_v1  ;;  %263 = vmatpush.bf16.msra.mxu1 %v260_v1 }
  0x1c   :  { %256 = vmatmul.msk.bf16.vlgmr.msra.gmra.mxu0 %vm113_vm0, %v258_v2  ;;  %257 = vmatmul.msk.bf16.vlgmr.msra.gmra.mxu1 %vm113_vm0, %v259_v3 }
  0x99   :  { %v129_v6 = vpop.f32.mrf.mxu0  ;;  %v134_v7 = vpop.f32.mrf.mxu1 }
  0x9a   :  { %v147_v8 = vadd.f32 %v273_v4, %v129_v6  ;;  %v149_v9 = vadd.f32 %v274_v5, %v134_v7 }
  0x9c   :  { %276 = vtanh.f32 %v147_v8 }
  0x9d   :  { %278 = vtanh.f32 %v149_v9 }
  0xa1   :  { %v131_v11 = vpop.f32.mrf.mxu0  ;;  %v136_v12 = vpop.f32.mrf.mxu1 }
  0xa2   :  { %v277_v13 = vpop.eup %276  ;;  %v148_v14 = vadd.f32 %v273_v4, %v131_v11  ;;  %v150_v15 = vadd.f32 %v274_v5, %v136_v12 }
  0xa3   :  { %v279_v16 = vpop.eup %278  ;;  %v159_v17 = vmul.f32 %v277_v13, %v275_v10 }
  0xa4   :  { %280 = vtanh.f32 %v148_v14  ;;  %v161_v18 = vmul.f32 %v279_v16, %v275_v10 }
  0xa5   :  { %282 = vtanh.f32 %v150_v15  ;;  %v163_v19 = vsel %vm113_vm0, %v159_v17, 0.0 }
  0xa6   :  { %v169_v20 = vsel %vm113_vm0, %v161_v18, 0.0  ;;  %164 = vadd.xlane.f32.xlu0 %v163_v19 }
  0xa7   :  { %170 = vadd.xlane.f32.xlu1 %v169_v20 }
  0xaa   :  { %v281_v21 = vpop.eup %280 }
  0xab   :  { %v283_v22 = vpop.eup %282  ;;  %v160_v23 = vmul.f32 %v281_v21, %v275_v10 }
  0xac   :  { %v162_v24 = vmul.f32 %v283_v22, %v275_v10 }
  0xad   :  { %v166_v25 = vsel %vm113_vm0, %v160_v23, 0.0 }
  0xae   :  { %v172_v26 = vsel %vm113_vm0, %v162_v24, 0.0  ;;  %167 = vadd.xlane.f32.xlu0 %v166_v25 }
  0xaf   :  { %173 = vadd.xlane.f32.xlu1 %v172_v26 }
 0x119   :  { %v165_v28 = vpop.xlane.xlu0 %164 }
 0x11a   :  { %v171_v29 = vpop.xlane.xlu1 %170  ;;  %v183_v34 = vperm.slane %v165_v28, %v182_v30 }
 0x11b   :  { %v188_v37 = vperm.slane %v171_v29, %v182_v30 }
 0x121   :  { %v168_v32 = vpop.xlane.xlu0 %167 }
 0x122   :  { %v174_v35 = vpop.xlane.xlu1 %173  ;;  %v185_v36 = vperm.slane %v168_v32, %v184_v31 }
 0x123   :  { %v189_v38 = vperm.slane %v174_v35, %v184_v31 }
 0x124   :  { %v187_v39 = vsel %vm186_vm1, %v185_v36, %v183_v34 }
 0x125   :  { %v190_v40 = vsel %vm186_vm1, %v189_v38, %v188_v37 }
 0x126   :  { %v192_v41 = vsel %vm191_vm2, %v190_v40, %v187_v39 }
 0x127   :  { %v194_v42 = vsel %vm176_vm3, %v192_v41, -inf }
 0x128   :  { %v196_v43 = vsel %vm195_vm4, %v194_v42, -inf }
 0x129   :  { %197 = vmax.xlane.f32.xlu2 %v196_v43 }
 0x19c   :  { %v198_v44 = vpop.xlane.xlu2 %197 }
 0x19d   :  { %v199_v45 = vsub.f32 %v194_v42, %v198_v44 }
 0x19f   :  { %v200_v46 = vmul.f32 1.442695, %v199_v45 }
 0x1a1   :  { %284 = vpow2.f32 %v200_v46 }
 0x1a7   :  { %v285_v47 = vpop.eup %284 }
 0x1a8   :  { %v202_v48 = vsel %vm195_vm4, %v285_v47, 0.0 }
 0x1a9   :  { %203 = vadd.xlane.f32.xlu2 %v202_v48 }
 0x21c   :  { %v204_v49 = vpop.xlane.xlu2 %203 }
 0x21d   :  { %286 = vrcp.f32 %v204_v49  ;;  %v216_v53 = vand.u32 2147483648, %v204_v49  ;;  %v214_v55 = vand.u32 2147483647, %v204_v49  ;;  %vm210_vm6 = vweird.f32 %v204_v49 }
 0x21f   :  { %v217_v57 = vor.u32 1.1754944e-38, %v216_v53  ;;  %vm215_vm8 = vcmp.eq.f32.partialorder %v214_v55, 8.507059e+37 }
 0x223   :  { %v287_v50 = vpop.eup %286 }
 0x224   :  { %v206_v51 = vmul.f32 %v287_v50, %v204_v49  ;;  %vm211_vm5 = vweird.f32 %v287_v50 }
 0x225   :  { %vm212_vm7 = vmor %vm210_vm6, %vm211_vm5 }
 0x226   :  { %v207_v52 = vsub.f32 1.0, %v206_v51 }
 0x228   :  { %v208_v54 = vmul.f32 %v287_v50, %v207_v52 }
 0x22a   :  { %v209_v56 = vadd.f32 %v287_v50, %v208_v54 }
 0x22c   :  { %v213_v58 = vsel %vm212_vm7, %v287_v50, %v209_v56 }
 0x22d   :  { %v218_v59 = vsel %vm215_vm8, %v217_v57, %v213_v58 }
 0x22e   :  { %v219_v60 = vmul.f32 %v285_v47, %v218_v59 }
 0x230   :  { %220 = vst.msk [vmem:[#allocation10] sm:$0x3] %vm195_vm4, %v219_v60 }
 0x231   :  { %231 = dma.vmem_to_hbm [thread:$0]  %s227_s15, 32, %s229_s18, [#allocation4]  }
 0x232   :  { %414 = dma.done.wait [#allocation4], 32  }
 0x233   :  { %415 = vsyncadd [#allocation4], 4294967264 }
 0x234   :  { %236 = vsyncpa [#allocation3], 1 }
 0x235   :  { %237 = vsyncpa [#allocation6], 1 }
 0x236   :  { %238 = vsyncpa [#allocation9], 1 }
 0x237   :  { %239 = vsyncpa [#allocation4], 1 }

</bundles_post_ra>
